<compile_context>
chip_gen: v6e
topology: v6e:2x2x1
jax: 0.10.0
libtpu: 0.0.40
codegen_flags: <defaults>
</compile_context>

<pallas_src>
import functools

import jax
import jax.numpy as jnp
from jax import lax
from jax.experimental import pallas as pl
from jax.experimental.pallas import tpu as pltpu

LANES = 128
_BLOCK_BYTES_PER_OPERAND = 1 << 20      # ~1 MiB per operand per block


# ----------------------------- kernels -------------------------------------


def _acc_add(acc_ref, vals):
    # (block_rows, 128) -> (8, 128) vreg-shaped partial via pure VPU adds.
    acc_ref[...] += vals.reshape(-1, 8, LANES).sum(axis=0)


def _tail_mask(nblk, block_rows, rows):
    base = (nblk - 1) * block_rows
    row_ids = base + lax.broadcasted_iota(jnp.int32, (block_rows, LANES), 0)
    return row_ids < rows


def _sum_sqdiff_kernel(p_ref, t_ref, o_ref, acc_ref, *,
                       multicore, per_core, nblk, block_rows, rows):
    """Partial sum of (p - t)^2 into a vreg-shaped VMEM accumulator."""
    if multicore:
        c = pl.program_id(0)
        i = pl.program_id(1)
        blk = c * per_core + i
    else:
        i = pl.program_id(0)
        blk = i

    @pl.when(i == 0)
    def _():
        acc_ref[...] = jnp.zeros_like(acc_ref)

    def body(masked):
        d = p_ref[...].astype(jnp.float32) - t_ref[...].astype(jnp.float32)
        sq = d * d
        if masked:
            sq = jnp.where(_tail_mask(nblk, block_rows, rows), sq, 0.0)
        _acc_add(acc_ref, sq)

    has_tail = (rows % block_rows) != 0
    if has_tail:
        # Only the final (partial) block pays the iota/compare/select cost.
        not_tail = blk != nblk - 1
        if multicore:
            not_tail = jnp.logical_and(not_tail, blk < nblk)

        @pl.when(not_tail)
        def _():
            body(False)

        @pl.when(blk == nblk - 1)
        def _():
            body(True)
    elif multicore:
        @pl.when(blk < nblk)
        def _():
            body(False)
    else:
        body(False)

    @pl.when(i == per_core - 1)
    def _():
        o_ref[0, 0] = jnp.sum(acc_ref[...])        # single cross-lane reduce


def _sum_sqdiff_weighted_kernel(p_ref, t_ref, w_ref, o_ref, acc_ref, *scratch,
                                multicore, per_core, nblk, block_rows, rows,
                                need_wsum):
    """Partial sums of [sum(w*(p-t)^2)] and (optionally) [sum(w)]."""
    wacc_ref = scratch[0] if need_wsum else None
    if multicore:
        c = pl.program_id(0)
        i = pl.program_id(1)
        blk = c * per_core + i
    else:
        i = pl.program_id(0)
        blk = i

    @pl.when(i == 0)
    def _():
        acc_ref[...] = jnp.zeros_like(acc_ref)
        if need_wsum:
            wacc_ref[...] = jnp.zeros_like(wacc_ref)

    def body(masked):
        d = p_ref[...].astype(jnp.float32) - t_ref[...].astype(jnp.float32)
        w = w_ref[...].astype(jnp.float32)
        sq = d * d * w
        if masked:
            valid = _tail_mask(nblk, block_rows, rows)
            sq = jnp.where(valid, sq, 0.0)
            if need_wsum:
                w = jnp.where(valid, w, 0.0)
        _acc_add(acc_ref, sq)
        if need_wsum:
            _acc_add(wacc_ref, w)

    has_tail = (rows % block_rows) != 0
    if has_tail:
        not_tail = blk != nblk - 1
        if multicore:
            not_tail = jnp.logical_and(not_tail, blk < nblk)

        @pl.when(not_tail)
        def _():
            body(False)

        @pl.when(blk == nblk - 1)
        def _():
            body(True)
    elif multicore:
        @pl.when(blk < nblk)
        def _():
            body(False)
    else:
        body(False)

    @pl.when(i == per_core - 1)
    def _():
        o_ref[0, 0] = jnp.sum(acc_ref[...])
        if need_wsum:
            o_ref[0, 1] = jnp.sum(wacc_ref[...])


def _elem_sqdiff_kernel(p_ref, t_ref, o_ref, *, scale):
    d = p_ref[...].astype(jnp.float32) - t_ref[...].astype(jnp.float32)
    sq = d * d
    if scale != 1.0:                      # loss_weight fused into the kernel
        sq = sq * jnp.float32(scale)
    o_ref[...] = sq.astype(o_ref.dtype)


def _elem_sqdiff_weighted_kernel(p_ref, t_ref, w_ref, o_ref, *, scale):
    d = p_ref[...].astype(jnp.float32) - t_ref[...].astype(jnp.float32)
    sq = d * d * w_ref[...].astype(jnp.float32)
    if scale != 1.0:
        sq = sq * jnp.float32(scale)
    o_ref[...] = sq.astype(o_ref.dtype)


# ----------------------------- glue ----------------------------------------


def _to_slab(x):
    """Flatten to a lane-dense (rows, 128) slab; no copy when numel % 128 == 0."""
    flat = x.reshape(-1)
    n = flat.shape[0]
    if n % LANES != 0:
        # TODO(synk): rare ragged path (numel % 128 != 0) still pays one
        # host-side pad copy; removing it needs lane masking on a 1-D HBM ref.
        flat = jnp.pad(flat, (0, LANES - n % LANES))
    rows = flat.shape[0] // LANES
    return flat.reshape(rows, LANES), rows


def _num_tensorcores():
    """Best-effort TensorCore count (2 on v7x, 1 on v5e/v6e)."""
    # TODO(synk): TpuInfo field name for the core count is probed defensively;
    # if it is not found we fall back to 1 core (correct, just no v7x split).
    try:
        info = pltpu.get_tpu_info()
    except Exception:
        return 1
    for name in ("num_cores", "core_count", "num_tensorcores",
                 "tensorcore_count", "num_cores_per_chip"):
        v = getattr(info, name, None)
        if isinstance(v, int) and 1 <= v <= 8:
            return v
    return 1


def _pick_block_rows(rows, itemsizes):
    """~1 MiB per operand per block, rounded to the dtype's sublane multiple."""
    sub = max(8, 32 // min(itemsizes))        # f32: 8, bf16: 16, int8/fp8: 32
    br = _BLOCK_BYTES_PER_OPERAND // (LANES * max(itemsizes))
    br = max(sub, (br // sub) * sub)
    rows_rounded = ((rows + sub - 1) // sub) * sub
    return min(br, rows_rounded)


def _vmem_limit(block_rows, itemsizes):
    live = 2 * sum(block_rows * LANES * s for s in itemsizes)   # double-buffered
    return int(min(64 << 20, max(32 << 20, live + (16 << 20))))


def _reduce_call(kernel, slabs, rows, n_scratch, out_cols):
    itemsizes = [s.dtype.itemsize for s in slabs]
    block_rows = _pick_block_rows(rows, itemsizes)
    nblk = pl.cdiv(rows, block_rows)
    ncores = _num_tensorcores()
    multicore = (ncores > 1) and (nblk >= 2 * ncores)

    if multicore:
        per_core = pl.cdiv(nblk, ncores)
        grid = (ncores, per_core)
        in_spec = pl.BlockSpec(
            (block_rows, LANES),
            lambda c, i: (jnp.minimum(c * per_core + i, nblk - 1), 0))
        out_spec = pl.BlockSpec((1, out_cols), lambda c, i: (c, 0),
                                memory_space=pltpu.SMEM)
        semantics = (pltpu.CORE_PARALLEL, pltpu.ARBITRARY)
        n_out_rows = ncores
    else:
        per_core = nblk
        grid = (nblk,)
        in_spec = pl.BlockSpec((block_rows, LANES), lambda i: (i, 0))
        out_spec = pl.BlockSpec((1, out_cols), lambda i: (0, 0),
                                memory_space=pltpu.SMEM)
        semantics = ("arbitrary",)
        n_out_rows = 1

    out = pl.pallas_call(
        functools.partial(kernel, multicore=multicore, per_core=per_core,
                          nblk=nblk, block_rows=block_rows, rows=rows),
        out_shape=jax.ShapeDtypeStruct((n_out_rows, out_cols), jnp.float32),
        grid_spec=pltpu.PrefetchScalarGridSpec(
            num_scalar_prefetch=0,
            grid=grid,
            in_specs=[in_spec] * len(slabs),
            out_specs=out_spec,
            scratch_shapes=[pltpu.VMEM((8, LANES), jnp.float32)] * n_scratch,
        ),
        compiler_params=pltpu.CompilerParams(
            dimension_semantics=semantics,
            vmem_limit_bytes=_vmem_limit(block_rows, itemsizes)),
    )(*slabs)
    return out


def _sum_sqdiff(pred, target):
    p, rows = _to_slab(pred)
    t, _ = _to_slab(target)
    out = _reduce_call(_sum_sqdiff_kernel, [p, t], rows, n_scratch=1, out_cols=1)
    return jnp.sum(out[:, 0])


def _sum_sqdiff_weighted(pred, target, weight, need_wsum):
    p, rows = _to_slab(pred)
    t, _ = _to_slab(target)
    w, _ = _to_slab(weight)
    kern = functools.partial(_sum_sqdiff_weighted_kernel, need_wsum=need_wsum)
    n_scratch = 2 if need_wsum else 1
    out_cols = 2 if need_wsum else 1
    out = _reduce_call(kern, [p, t, w], rows, n_scratch=n_scratch,
                       out_cols=out_cols)
    total = jnp.sum(out[:, 0])
    wsum = jnp.sum(out[:, 1]) if need_wsum else jnp.float32(0.0)
    return total, wsum


def _elem_sqdiff(pred, target, weight, scale):
    p, rows = _to_slab(pred)
    t, _ = _to_slab(target)
    n = pred.size
    if weight is None:
        slabs = [p, t]
        kernel = _elem_sqdiff_kernel
    else:
        w, _ = _to_slab(weight)
        slabs = [p, t, w]
        kernel = _elem_sqdiff_weighted_kernel

    itemsizes = [s.dtype.itemsize for s in slabs] + [pred.dtype.itemsize]
    block_rows = _pick_block_rows(rows, itemsizes)
    nblk = pl.cdiv(rows, block_rows)
    ncores = _num_tensorcores()
    multicore = (ncores > 1) and (nblk >= 2 * ncores)

    if multicore:
        per_core = pl.cdiv(nblk, ncores)
        grid = (ncores, per_core)
        # Overflow steps on the last core recompute/rewrite the last block
        # (idempotent); waste is bounded to ~1 MiB per operand.
        imap = lambda c, i: (jnp.minimum(c * per_core + i, nblk - 1), 0)
        semantics = (pltpu.CORE_PARALLEL, pltpu.ARBITRARY)
    else:
        grid = (nblk,)
        imap = lambda i: (i, 0)
        semantics = ("parallel",)

    spec = pl.BlockSpec((block_rows, LANES), imap)
    out = pl.pallas_call(
        functools.partial(kernel, scale=scale),
        out_shape=jax.ShapeDtypeStruct((rows, LANES), pred.dtype),
        grid_spec=pltpu.PrefetchScalarGridSpec(
            num_scalar_prefetch=0,
            grid=grid,
            in_specs=[spec] * len(slabs),
            out_specs=spec,
        ),
        compiler_params=pltpu.CompilerParams(
            dimension_semantics=semantics,
            vmem_limit_bytes=_vmem_limit(block_rows, itemsizes)),
    )(*slabs)
    flat = out.reshape(-1)
    if flat.shape[0] != n:          # rare ragged-tail path only
        flat = flat[:n]
    return flat.reshape(pred.shape)


# ----------------------------- module wrapper -------------------------------


class MSELoss:
    """JAX/Pallas port of basicsr MSELoss."""

    def __init__(self, loss_weight=1.0, reduction='mean'):
        if reduction not in ('none', 'mean', 'sum'):
            raise ValueError(f'Unsupported reduction mode: {reduction}.')
        self.loss_weight = float(loss_weight)
        self.reduction = reduction

    def __call__(self, pred, target, weight=None, **kwargs):
        assert pred.shape == target.shape

        if self.reduction == 'none':
            # loss_weight fused into the elementwise kernel.
            return _elem_sqdiff(pred, target, weight, self.loss_weight)

        lw = jnp.float32(self.loss_weight)

        if weight is None:
            total = _sum_sqdiff(pred, target)
            if self.reduction == 'mean':
                total = total / jnp.float32(pred.size)
            return (lw * total).astype(pred.dtype)

        # weighted, reduced
        need_wsum = (self.reduction == 'mean')
        total, wsum = _sum_sqdiff_weighted(pred, target, weight, need_wsum)
        if self.reduction == 'sum':
            return (lw * total).astype(pred.dtype)
        # 'mean' with weight (basicsr weight_reduce_loss semantics)
        c = pred.shape[1] if pred.ndim >= 2 else 1
        if weight.ndim >= 2 and weight.shape[1] == 1:
            norm = wsum * jnp.float32(c)
        else:
            norm = wsum
        return (lw * total / norm).astype(pred.dtype)


# ----------------------------- demo / test ----------------------------------

if __name__ == "__main__":
    key = jax.random.PRNGKey(0)
    k1, k2, k3 = jax.random.split(key, 3)

    # layout: NCHW, matching the PyTorch module's documented input shapes.
    N, C, H, W = 2, 4, 16, 16
    pred = jax.random.normal(k1, (N, C, H, W), dtype=jnp.float32)
    target = jax.random.normal(k2, (N, C, H, W), dtype=jnp.float32)
    weight = jax.random.uniform(k3, (N, C, H, W), dtype=jnp.float32)

    loss_fn = MSELoss(loss_weight=1.0, reduction='mean')

    # mean, no weight
    out_mean = jax.block_until_ready(loss_fn(pred, target))
    ref_mean = jnp.mean((pred - target) ** 2)
    assert jnp.allclose(out_mean, ref_mean, rtol=1e-5, atol=1e-5), (out_mean, ref_mean)

    # sum
    out_sum = jax.block_until_ready(MSELoss(reduction='sum')(pred, target))
    ref_sum = jnp.sum((pred - target) ** 2)
    assert jnp.allclose(out_sum, ref_sum, rtol=1e-5, atol=1e-4), (out_sum, ref_sum)

    # none (with fused loss_weight)
    out_none = jax.block_until_ready(MSELoss(loss_weight=2.0, reduction='none')(pred, target))
    ref_none = 2.0 * (pred - target) ** 2
    assert out_none.shape == (N, C, H, W)
    assert jnp.allclose(out_none, ref_none, rtol=1e-5, atol=1e-5)

    # weighted mean (basicsr: sum(w*(p-t)^2) / sum(w) when weight has C>1)
    out_wmean = jax.block_until_ready(loss_fn(pred, target, weight))
    ref_wmean = jnp.sum(weight * (pred - target) ** 2) / jnp.sum(weight)
    assert jnp.allclose(out_wmean, ref_wmean, rtol=1e-5, atol=1e-5), (out_wmean, ref_wmean)

    # weighted sum (exercises the single-scratch / single-column path)
    out_wsum = jax.block_until_ready(MSELoss(reduction='sum')(pred, target, weight))
    ref_wsum = jnp.sum(weight * (pred - target) ** 2)
    assert jnp.allclose(out_wsum, ref_wsum, rtol=1e-5, atol=1e-4), (out_wsum, ref_wsum)

    # ragged size: exercises the pl.when-gated tail-row masking path
    pr = jax.random.normal(k1, (2, 3, 7, 5), dtype=jnp.float32)
    tr = jax.random.normal(k2, (2, 3, 7, 5), dtype=jnp.float32)
    out_r = jax.block_until_ready(MSELoss(reduction='mean')(pr, tr))
    ref_r = jnp.mean((pr - tr) ** 2)
    assert jnp.allclose(out_r, ref_r, rtol=1e-5, atol=1e-5), (out_r, ref_r)

    print("KERNEL_OK")
</pallas_src>

<mosaic_0001>
module attributes {stable_mosaic.version = 11 : i64} {
  func.func @_sum_sqdiff_kernel(%arg0: i32, %arg1: memref<16x128xf32, #tpu.memory_space<vmem>>, %arg2: memref<16x128xf32, #tpu.memory_space<vmem>>, %arg3: memref<1x1xf32, #tpu.memory_space<smem>>, %arg4: memref<8x128xf32, #tpu.memory_space<vmem>>) attributes {dimension_semantics = [#tpu.dimension_semantics<arbitrary>], iteration_bounds = array<i64: 1>, scalar_prefetch = 0 : i64, scratch_operands = 1 : i64, tpu.core_type = #tpu.core_type<tc>, window_params = [{transform_indices = @transform_0, window_bounds = array<i64: 16, 128>}, {transform_indices = @transform_1, window_bounds = array<i64: 16, 128>}, {transform_indices = @transform_2, window_bounds = array<i64: 1, 1>}]} {
    %c0_i32 = arith.constant 0 : i32
    %0 = arith.cmpi eq, %arg0, %c0_i32 : i32
    %1 = arith.extui %0 : i1 to i32
    %c0_i32_0 = arith.constant 0 : i32
    %2 = arith.cmpi ne, %1, %c0_i32_0 : i32
    scf.if %2 {
      %cst_10 = arith.constant 0.000000e+00 : f32
      %15 = vector.broadcast %cst_10 : f32 to vector<8x128xf32>
      %c0_11 = arith.constant 0 : index
      %c0_12 = arith.constant 0 : index
      %16 = vector.load %arg4[%c0_11, %c0_12] : memref<8x128xf32, #tpu.memory_space<vmem>>, vector<8x128xf32>
      tpu.vector_store %arg4[%c0_11, %c0_12], %15 {strides = array<i32>} : memref<8x128xf32, #tpu.memory_space<vmem>>, vector<8x128xf32>,
    } else {
    }
    %c0 = arith.constant 0 : index
    %c0_1 = arith.constant 0 : index
    %3 = vector.load %arg1[%c0, %c0_1] : memref<16x128xf32, #tpu.memory_space<vmem>>, vector<16x128xf32>
    %c0_2 = arith.constant 0 : index
    %c0_3 = arith.constant 0 : index
    %4 = vector.load %arg2[%c0_2, %c0_3] : memref<16x128xf32, #tpu.memory_space<vmem>>, vector<16x128xf32>
    %5 = arith.subf %3, %4 : vector<16x128xf32>
    %6 = arith.mulf %5, %5 : vector<16x128xf32>
    %c0_4 = arith.constant 0 : index
    %c0_5 = arith.constant 0 : index
    %7 = vector.load %arg4[%c0_4, %c0_5] : memref<8x128xf32, #tpu.memory_space<vmem>>, vector<8x128xf32>
    %8 = vector.shape_cast %6 : vector<16x128xf32> to vector<2x8x128xf32>
    %cst = arith.constant dense<0.000000e+00> : vector<8x128xf32>
    %9 = vector.multi_reduction <add>, %8, %cst [0] : vector<2x8x128xf32> to vector<8x128xf32>
    %10 = arith.addf %7, %9 : vector<8x128xf32>
    %c0_6 = arith.constant 0 : index
    %c0_7 = arith.constant 0 : index
    %11 = vector.load %arg4[%c0_6, %c0_7] : memref<8x128xf32, #tpu.memory_space<vmem>>, vector<8x128xf32>
    tpu.vector_store %arg4[%c0_6, %c0_7], %10 {strides = array<i32>} : memref<8x128xf32, #tpu.memory_space<vmem>>, vector<8x128xf32>,
    %c0_i32_8 = arith.constant 0 : i32
    %12 = arith.cmpi eq, %arg0, %c0_i32_8 : i32
    %13 = arith.extui %12 : i1 to i32
    %c0_i32_9 = arith.constant 0 : i32
    %14 = arith.cmpi ne, %13, %c0_i32_9 : i32
    scf.if %14 {
      %c0_10 = arith.constant 0 : index
      %c0_11 = arith.constant 0 : index
      %15 = vector.load %arg4[%c0_10, %c0_11] : memref<8x128xf32, #tpu.memory_space<vmem>>, vector<8x128xf32>
      %16 = vector.shape_cast %15 : vector<8x128xf32> to vector<1x8x128xf32>
      %cst_12 = arith.constant dense<0.000000e+00> : vector<1xf32>
      %17 = vector.multi_reduction <add>, %16, %cst_12 [1, 2] : vector<1x8x128xf32> to vector<1xf32>
      %18 = vector.shape_cast %17 : vector<1xf32> to vector<1x1x1xf32>
      %19 = vector.extract %18[0, 0, 0] : f32 from vector<1x1x1xf32>
      %c0_13 = arith.constant 0 : index
      %c0_14 = arith.constant 0 : index
      %20 = memref.load %arg3[%c0_13, %c0_14] : memref<1x1xf32, #tpu.memory_space<smem>>
      memref.store %19, %arg3[%c0_13, %c0_14] : memref<1x1xf32, #tpu.memory_space<smem>>
    } else {
    }
    return
  }
  func.func @transform_0(%arg0: i32) -> (i32, i32) {
    %c0_i32 = arith.constant 0 : i32
    %c0_i32_0 = arith.constant 0 : i32
    return %arg0, %c0_i32 : i32, i32
  }
  func.func @transform_1(%arg0: i32) -> (i32, i32) {
    %c0_i32 = arith.constant 0 : i32
    %c0_i32_0 = arith.constant 0 : i32
    return %arg0, %c0_i32 : i32, i32
  }
  func.func @transform_2(%arg0: i32) -> (i32, i32) {
    %c0_i32 = arith.constant 0 : i32
    %c0_i32_0 = arith.constant 0 : i32
    %c0_i32_1 = arith.constant 0 : i32
    return %c0_i32, %c0_i32_0 : i32, i32
  }
}

</mosaic_0001>

<bundles_post_ra>
// kernel: tpu_custom_call.1
= control target key start
LH: loop header
LB: loop body
LE: loop exit
PB: predicated region body
PF: predicated region fallthrough
CT: control target
= control target key end

     0   :  { %7 = vsyncpa [#allocation4], 0  ;;  %s177_s0 = inlined_call_operand.hbm [shape: f32[16,128], index: 0, kind: input, shape index: {}]   ;;  %s178_s1 = inlined_call_operand.hbm [shape: f32[16,128], index: 1, kind: input, shape index: {}]   ;;  %s179_s2 = inlined_call_operand.hbm [shape: f32[1,1], index: 2, kind: output, shape index: {}]  }
   0x1   :  { %8 = vsyncpa [#allocation7], 0 }
   0x2   :  { %9 = vsyncpa [#allocation5], 0  ;;  %s148_s9 = smov [#allocation3]  }
   0x3   :  { %s15_s10 = sshll.u32 %s148_s9, 4  ;;  %s16_s10 = int_to_ptr.vmem [resolvable:$true] %s15_s10 }
   0x4   :  { %s102_s11 = scalar_lea.vmem %s16_s10, 256  ;;  %p107_p1 = scmp.lt.s32.totalorder %s16_s10, %s16_s10 }
   0x5   :  { %p103_p0 = scmp.ne.s32.totalorder %s16_s10, %s102_s11  ;;  %p108_p2 = scmp.lt.s32.totalorder %s102_s11, %s102_s11 }
   0x7   :  { %p109_p3 = por %p108_p2, %p107_p1 }
   0x9   :  { %p110_p4 = pnand %p109_p3, %p103_p0 }
   0xb   :  { %113 = shalt.err (!%p110_p4)
}
   0xc   :  { %s149_s12 = smov 128   ;;  %s150_s13 = smov 8  }
   0xd   :  { %21 = dma.hbm_to_vmem [thread:$0]  %s177_s0, 256, %s16_s10, [#allocation4], %s149_s12, %s149_s12, %s150_s13  }
   0xe   :  { %s151_s16 = smov [#allocation6]  }
   0xf   :  { %s27_s17 = sshll.u32 %s151_s16, 4  ;;  %s28_s17 = int_to_ptr.vmem [resolvable:$true] %s27_s17 }
  0x10   :  { %s122_s18 = scalar_lea.vmem %s28_s17, 256  ;;  %p127_p6 = scmp.lt.s32.totalorder %s28_s17, %s28_s17 }
  0x11   :  { %p123_p5 = scmp.ne.s32.totalorder %s28_s17, %s122_s18  ;;  %p128_p7 = scmp.lt.s32.totalorder %s122_s18, %s122_s18 }
  0x13   :  { %p129_p8 = por %p128_p7, %p127_p6 }
  0x15   :  { %p130_p9 = pnand %p129_p8, %p123_p5 }
  0x17   :  { %133 = shalt.err (!%p130_p9)
}
  0x18   :  { %33 = dma.hbm_to_vmem [thread:$0]  %s178_s1, 256, %s28_s17, [#allocation7], %s149_s12, %s149_s12, %s150_s13  }
  0x19   :  { %142 = dma.done.wait [#allocation4], 256  }
  0x1a   :  { %143 = vsyncadd [#allocation4], 4294967040 }
  0x1b   :  { %144 = dma.done.wait [#allocation7], 256  }
  0x1c   :  { %145 = vsyncadd [#allocation7], 4294967040  ;;  %v45_v0 = vld [vmem:[#allocation3] sm:$0xff]  ;;  %v46_v1 = vld [vmem:[#allocation3 + $0x8] sm:$0xff]  ;;  %s152_s1 = smov [#allocation8]  }
  0x1d   :  { %v47_v2 = vld [vmem:[#allocation6] sm:$0xff]  ;;  %v48_v3 = vld [vmem:[#allocation6 + $0x8] sm:$0xff] }
  0x1e   :  { %v49_v4 = vsub.f32 %v45_v0, %v47_v2  ;;  %v50_v5 = vsub.f32 %v46_v1, %v48_v3 }
  0x20   :  { %v51_v6 = vmul.f32 %v49_v4, %v49_v4  ;;  %v52_v7 = vmul.f32 %v50_v5, %v50_v5 }
  0x22   :  { %v54_v8 = vadd.f32 %v52_v7, %v51_v6 }
  0x24   :  { %61 = vadd.xlane.f32.xlu0 %v54_v8 }
  0xad   :  { %v62_v9 = vpop.xlane.xlu0 %61 }
  0xae   :  { %v63_v10 = vrot.slane %v62_v9, 4 }
  0xb0   :  { %v64_v11 = vadd.f32 %v63_v10, %v62_v9 }
  0xb2   :  { %v65_v12 = vrot.slane %v64_v11, 2 }
  0xb4   :  { %v66_v13 = vadd.f32 %v65_v12, %v64_v11 }
  0xb6   :  { %v67_v14 = vrot.slane %v66_v13, 1 }
  0xb8   :  { %v68_v15 = vadd.f32 %v67_v14, %v66_v13 }
  0xba   :  { %87 = vpush %v68_v15 }
  0xeb   :  { %s88_s0 = spop %87 }
  0xec   :  { %71 = sst [smem:[#allocation8]] %s88_s0 }
  0xed   :  { %79 = dma.smem_to_hbm %s152_s1, 16, %s179_s2, [#allocation5]  }
  0xee   :  { %146 = dma.done.wait [#allocation5], 16  }
  0xef   :  { %147 = vsyncadd [#allocation5], 4294967280 }
  0xf0   :  { %83 = sfence }
  0xf1   :  { %84 = vsyncpa [#allocation4], 1 }
  0xf2   :  { %85 = vsyncpa [#allocation7], 1 }
  0xf3   :  { %86 = vsyncpa [#allocation5], 1 }

</bundles_post_ra>
